<compile_context>
chip_gen: v6e
topology: v6e:2x2x1
jax: 0.10.0
libtpu: 0.0.40
codegen_flags: <defaults>
</compile_context>

<pallas_src>
import functools

import jax
import jax.numpy as jnp
from jax.experimental import pallas as pl
from jax.experimental.pallas import tpu as pltpu

P_DROP = 0.3
KEEP = 1.0 - P_DROP
# keep element iff 32-bit uniform draw < KEEP * 2^32 (inverted dropout)
_KEEP_THRESH_U32 = int(KEEP * (1 << 32))


def _mlp_kernel(x_ref, w1_ref, b1_ref, w2_ref, b2_ref, *rest, training):
    if training:
        bits_ref, o_ref = rest
    else:
        (o_ref,) = rest

    # hidden = relu(x @ w1 + b1)   (MXU matmul, f32 accumulation)
    h = jnp.dot(x_ref[...], w1_ref[...], preferred_element_type=jnp.float32)
    h = jnp.maximum(h + b1_ref[...], 0.0)          # b1 is (1, H), broadcasts

    if training:
        # Inverted dropout p=0.3: single 32-bit compare per hidden element.
        keep = bits_ref[...] < jnp.uint32(_KEEP_THRESH_U32)
        h = jnp.where(keep, h * jnp.float32(1.0 / KEEP), jnp.float32(0.0))

    # out = h @ w2 + b2
    h = h.astype(w2_ref.dtype)                     # bf16 operand for 2nd MXU pass
    out = jnp.dot(h, w2_ref[...], preferred_element_type=jnp.float32)
    o_ref[...] = (out + b2_ref[...]).astype(o_ref.dtype)


def _round_up(n, m):
    return ((n + m - 1) // m) * m


@functools.partial(jax.jit, static_argnames=("training", "compute_dtype", "block_b"))
def net_forward(x, w1, b1, w2, b2, dropout_key, *, training=True,
                compute_dtype=jnp.bfloat16, block_b=512):
    """x:(B,F) f32, w1:(F,H), b1:(H,), w2:(H,O), b2:(O,). Returns (B,O) f32.

    Weights are stored transposed vs torch (w1:(F,H), w2:(H,O)) so the kernel
    does plain x @ w + b, matching Net.forward semantics.
    """
    B, F = x.shape
    H = w1.shape[1]
    O = w2.shape[1]

    # Batch tile: multiple of 8 sublanes, capped at block_b rows so the
    # double-buffered x/bits/out tiles stay tiny vs VMEM (fits v7x's 64 MiB as
    # well as v5e/v6e's 128 MiB with the default scoped limit).
    TB = min(block_b, _round_up(B, 8))
    B_pad = _round_up(B, TB)
    grid = (B_pad // TB,)

    xp = jnp.pad(x, ((0, B_pad - B), (0, 0))) if B_pad != B else x

    # bf16 MXU operands (native on v6e/v7x); accumulation stays f32 in-kernel.
    xc = xp.astype(compute_dtype)
    w1c = w1.astype(compute_dtype)
    w2c = w2.astype(compute_dtype)
    b1_2d = b1.reshape(1, H).astype(jnp.float32)
    b2_2d = b2.reshape(1, O).astype(jnp.float32)

    in_specs = [
        pl.BlockSpec((TB, F), lambda i: (i, 0)),   # x: tiled over batch
        pl.BlockSpec((F, H), lambda i: (0, 0)),    # weights stay VMEM-resident
        pl.BlockSpec((1, H), lambda i: (0, 0)),
        pl.BlockSpec((H, O), lambda i: (0, 0)),
        pl.BlockSpec((1, O), lambda i: (0, 0)),
    ]
    inputs = [xc, w1c, b1_2d, w2c, b2_2d]

    bytes_accessed = (xc.size * xc.dtype.itemsize
                      + w1c.size * w1c.dtype.itemsize
                      + w2c.size * w2c.dtype.itemsize
                      + (b1_2d.size + b2_2d.size) * 4
                      + B_pad * O * 4)

    if training:
        # Host-side uniform u32 draws, one per hidden activation, tiled with x
        # so each batch tile gets its own independent dropout mask.
        # TODO(synk): switch back to in-kernel pltpu.prng_seed/prng_random_bits
        # (HW PRNG, zero HBM traffic for the mask) once the interpret harness
        # supports those primitives.
        bits = jax.random.bits(dropout_key, (B_pad, H), dtype=jnp.uint32)
        in_specs.append(pl.BlockSpec((TB, H), lambda i: (i, 0)))
        inputs.append(bits)
        bytes_accessed += bits.size * 4

    cost = pl.CostEstimate(
        flops=2 * B_pad * (F * H + H * O),
        transcendentals=0,
        bytes_accessed=bytes_accessed,
    )

    out = pl.pallas_call(
        functools.partial(_mlp_kernel, training=training),
        out_shape=jax.ShapeDtypeStruct((B_pad, O), jnp.float32),
        grid=grid,
        in_specs=in_specs,
        out_specs=pl.BlockSpec((TB, O), lambda i: (i, 0)),
        compiler_params=pltpu.CompilerParams(
            dimension_semantics=("parallel",)),   # shard batch tiles across TCs (v7x)
        cost_estimate=cost,
    )(*inputs)

    return out[:B]


def init_params(key, n_feature, n_hidden, n_output):
    """Deterministic init matching torch.nn.Linear's U(-1/sqrt(fan_in), 1/sqrt(fan_in))."""
    k1, k2, k3, k4 = jax.random.split(key, 4)
    lim1 = 1.0 / (n_feature ** 0.5)
    lim2 = 1.0 / (n_hidden ** 0.5)
    w1 = jax.random.uniform(k1, (n_feature, n_hidden), jnp.float32, -lim1, lim1)
    b1 = jax.random.uniform(k2, (n_hidden,), jnp.float32, -lim1, lim1)
    w2 = jax.random.uniform(k3, (n_hidden, n_output), jnp.float32, -lim2, lim2)
    b2 = jax.random.uniform(k4, (n_output,), jnp.float32, -lim2, lim2)
    return w1, b1, w2, b2


if __name__ == "__main__":
    key = jax.random.PRNGKey(0)
    kx, kp, kd = jax.random.split(key, 3)

    B, n_feature, n_hidden, n_output = 8, 16, 32, 4
    x = jax.random.normal(kx, (B, n_feature), jnp.float32)
    w1, b1, w2, b2 = init_params(kp, n_feature, n_hidden, n_output)

    # Training forward (bf16 MXU operands, inverted dropout p=0.3).
    out = jax.block_until_ready(net_forward(x, w1, b1, w2, b2, kd, training=True))
    assert out.shape == (B, n_output) and out.dtype == jnp.float32
    assert bool(jnp.all(jnp.isfinite(out)))

    # Eval-mode sanity check in full f32 against a plain-JAX reference.
    out_eval = jax.block_until_ready(
        net_forward(x, w1, b1, w2, b2, kd, training=False,
                    compute_dtype=jnp.float32))
    ref_eval = jnp.maximum(x @ w1 + b1, 0.0) @ w2 + b2
    assert jnp.allclose(out_eval, ref_eval, atol=1e-5, rtol=1e-5)

    # bf16 eval path runs and is numerically close (loose tolerance for bf16).
    out_eval_bf16 = jax.block_until_ready(
        net_forward(x, w1, b1, w2, b2, kd, training=False))
    assert jnp.allclose(out_eval_bf16, ref_eval, atol=1e-1, rtol=1e-1)

    print("KERNEL_OK")
</pallas_src>

<mosaic_0001>
module attributes {stable_mosaic.version = 11 : i64} {
  func.func @_mlp_kernel(%arg0: i32, %arg1: memref<8x16xbf16, #tpu.memory_space<vmem>>, %arg2: memref<16x32xbf16, #tpu.memory_space<vmem>>, %arg3: memref<1x32xf32, #tpu.memory_space<vmem>>, %arg4: memref<32x4xbf16, #tpu.memory_space<vmem>>, %arg5: memref<1x4xf32, #tpu.memory_space<vmem>>, %arg6: memref<8x32xi32, #tpu.memory_space<vmem>>, %arg7: memref<8x4xf32, #tpu.memory_space<vmem>>) attributes {dimension_semantics = [#tpu.dimension_semantics<parallel>], iteration_bounds = array<i64: 1>, scalar_prefetch = 0 : i64, scratch_operands = 0 : i64, tpu.core_type = #tpu.core_type<tc>, window_params = [{transform_indices = @transform_0, window_bounds = array<i64: 8, 16>}, {pipeline_mode = #tpu.pipeline_mode<synchronous>, transform_indices = @transform_1, window_bounds = array<i64: 16, 32>}, {pipeline_mode = #tpu.pipeline_mode<synchronous>, transform_indices = @transform_2, window_bounds = array<i64: 1, 32>}, {pipeline_mode = #tpu.pipeline_mode<synchronous>, transform_indices = @transform_3, window_bounds = array<i64: 32, 4>}, {pipeline_mode = #tpu.pipeline_mode<synchronous>, transform_indices = @transform_4, window_bounds = array<i64: 1, 4>}, {transform_indices = @transform_5, window_bounds = array<i64: 8, 32>}, {transform_indices = @transform_6, window_bounds = array<i64: 8, 4>}]} {
    %c0 = arith.constant 0 : index
    %c0_0 = arith.constant 0 : index
    %0 = vector.load %arg1[%c0, %c0_0] : memref<8x16xbf16, #tpu.memory_space<vmem>>, vector<8x16xbf16>
    %c0_1 = arith.constant 0 : index
    %c0_2 = arith.constant 0 : index
    %1 = vector.load %arg2[%c0_1, %c0_2] : memref<16x32xbf16, #tpu.memory_space<vmem>>, vector<16x32xbf16>
    %cst = arith.constant dense<0.000000e+00> : vector<8x32xf32>
    %2 = tpu.matmul %0, %1, %cst {dimension_numbers = #tpu.dot_dimension_numbers<[1], [0], [0], [1], [0, 0, 1, 1], [], []>} : vector<8x16xbf16>, vector<16x32xbf16>, vector<8x32xf32> -> vector<8x32xf32>
    %c0_3 = arith.constant 0 : index
    %c0_4 = arith.constant 0 : index
    %3 = vector.load %arg3[%c0_3, %c0_4] : memref<1x32xf32, #tpu.memory_space<vmem>>, vector<1x32xf32>
    %4 = vector.broadcast %3 : vector<1x32xf32> to vector<8x32xf32>
    %5 = arith.addf %2, %4 : vector<8x32xf32>
    %cst_5 = arith.constant 0.000000e+00 : f32
    %6 = vector.broadcast %cst_5 : f32 to vector<8x32xf32>
    %7 = arith.maximumf %5, %6 : vector<8x32xf32>
    %c0_6 = arith.constant 0 : index
    %c0_7 = arith.constant 0 : index
    %8 = vector.load %arg6[%c0_6, %c0_7] : memref<8x32xi32, #tpu.memory_space<vmem>>, vector<8x32xi32>
    %c-1288490189_i32 = arith.constant -1288490189 : i32
    %9 = vector.broadcast %c-1288490189_i32 : i32 to vector<8x32xi32>
    %10 = arith.cmpi ult, %8, %9 : vector<8x32xi32>
    %cst_8 = arith.constant 1.42857146 : f32
    %11 = vector.broadcast %cst_8 : f32 to vector<8x32xf32>
    %12 = arith.mulf %7, %11 : vector<8x32xf32>
    %cst_9 = arith.constant 0.000000e+00 : f32
    %13 = vector.broadcast %cst_9 : f32 to vector<8x32xf32>
    %14 = arith.select %10, %12, %13 : vector<8x32xi1>, vector<8x32xf32>
    %15 = arith.truncf %14 : vector<8x32xf32> to vector<8x32xbf16>
    %c0_10 = arith.constant 0 : index
    %c0_11 = arith.constant 0 : index
    %16 = vector.load %arg4[%c0_10, %c0_11] : memref<32x4xbf16, #tpu.memory_space<vmem>>, vector<32x4xbf16>
    %cst_12 = arith.constant dense<0.000000e+00> : vector<8x4xf32>
    %17 = tpu.matmul %15, %16, %cst_12 {dimension_numbers = #tpu.dot_dimension_numbers<[1], [0], [0], [1], [0, 0, 1, 1], [], []>} : vector<8x32xbf16>, vector<32x4xbf16>, vector<8x4xf32> -> vector<8x4xf32>
    %c0_13 = arith.constant 0 : index
    %c0_14 = arith.constant 0 : index
    %18 = vector.load %arg5[%c0_13, %c0_14] : memref<1x4xf32, #tpu.memory_space<vmem>>, vector<1x4xf32>
    %19 = vector.broadcast %18 : vector<1x4xf32> to vector<8x4xf32>
    %20 = arith.addf %17, %19 : vector<8x4xf32>
    %c0_15 = arith.constant 0 : index
    %c0_16 = arith.constant 0 : index
    %21 = vector.load %arg7[%c0_15, %c0_16] : memref<8x4xf32, #tpu.memory_space<vmem>>, vector<8x4xf32>
    tpu.vector_store %arg7[%c0_15, %c0_16], %20 {strides = array<i32>} : memref<8x4xf32, #tpu.memory_space<vmem>>, vector<8x4xf32>,
    return
  }
  func.func @transform_0(%arg0: i32) -> (i32, i32) {
    %c0_i32 = arith.constant 0 : i32
    %c0_i32_0 = arith.constant 0 : i32
    return %arg0, %c0_i32 : i32, i32
  }
  func.func @transform_1(%arg0: i32) -> (i32, i32) {
    %c0_i32 = arith.constant 0 : i32
    %c0_i32_0 = arith.constant 0 : i32
    %c0_i32_1 = arith.constant 0 : i32
    return %c0_i32, %c0_i32_0 : i32, i32
  }
  func.func @transform_2(%arg0: i32) -> (i32, i32) {
    %c0_i32 = arith.constant 0 : i32
    %c0_i32_0 = arith.constant 0 : i32
    %c0_i32_1 = arith.constant 0 : i32
    return %c0_i32, %c0_i32_0 : i32, i32
  }
  func.func @transform_3(%arg0: i32) -> (i32, i32) {
    %c0_i32 = arith.constant 0 : i32
    %c0_i32_0 = arith.constant 0 : i32
    %c0_i32_1 = arith.constant 0 : i32
    return %c0_i32, %c0_i32_0 : i32, i32
  }
  func.func @transform_4(%arg0: i32) -> (i32, i32) {
    %c0_i32 = arith.constant 0 : i32
    %c0_i32_0 = arith.constant 0 : i32
    %c0_i32_1 = arith.constant 0 : i32
    return %c0_i32, %c0_i32_0 : i32, i32
  }
  func.func @transform_5(%arg0: i32) -> (i32, i32) {
    %c0_i32 = arith.constant 0 : i32
    %c0_i32_0 = arith.constant 0 : i32
    return %arg0, %c0_i32 : i32, i32
  }
  func.func @transform_6(%arg0: i32) -> (i32, i32) {
    %c0_i32 = arith.constant 0 : i32
    %c0_i32_0 = arith.constant 0 : i32
    return %arg0, %c0_i32 : i32, i32
  }
}

</mosaic_0001>

<bundles_post_ra>
// kernel: net_forward.1
= control target key start
LH: loop header
LB: loop body
LE: loop exit
PB: predicated region body
PF: predicated region fallthrough
CT: control target
= control target key end

     0   :  { %v194_v0 = vmov 0.0   ;;  %vm195_vm0 = vmmov 0   ;;  %vm40_vm1 = vcmask 130048   ;;  %vm113_vm3 = vcmask 261120   ;;  %s255_s1 = inlined_call_operand.vmem [shape: bf16[16,32], index: 1, kind: input, shape index: {}]   ;;  %s256_s0 = inlined_call_operand.vmem [shape: bf16[8,16], index: 0, kind: input, shape index: {}]   ;;  %s257_s3 = inlined_call_operand.vmem [shape: bf16[32,4], index: 3, kind: input, shape index: {}]   ;;  %s258_s2 = inlined_call_operand.vmem [shape: f32[1,32], index: 2, kind: input, shape index: {}]   ;;  %s259_s5 = inlined_call_operand.vmem [shape: u32[8,32], index: 5, kind: input, shape index: {}]   ;;  %s260_s4 = inlined_call_operand.vmem [shape: f32[1,4], index: 4, kind: input, shape index: {}]   ;;  %s261_s6 = inlined_call_operand.vmem [shape: f32[8,4], index: 6, kind: output, shape index: {}]  }
   0x1   :  { %175 = vmatprep.subr.bf16.mxu0 %v194_v0  ;;  %v191_v1 = vld [vmem:[%s255_s1] sm:$0xff]   ;;  %177 = vmatprep.mubr.msk.bf16.mxu0 %vm195_vm0, %v194_v0  ;;  %v192_v3 = vld [vmem:[%s257_s3 + $0x8] sm:$0xff]   ;;  %vm157_vm4 = vcmask 31744  }
   0x2   :  { %181 = vmatprep.subr.bf16.mxu1 %v194_v0  ;;  %185 = vmatprep.mubr.msk.bf16.mxu1 %vm195_vm0, %v194_v0  ;;  %v24_v2 = vld [vmem:[%s256_s0] sm:$0xf] }
   0x3   :  { %176 = vmatpush3.bf16.msra.mxu0 %v191_v1  ;;  %182 = vmatpush3.bf16.msra.mxu1 %v192_v3  ;;  %v193_v4 = vld [vmem:[%s257_s3] sm:$0xff]  }
   0x4   :  { %183 = vmatprep.subr.bf16.mxu1 %v194_v0  ;;  %v163_v5 = vld [vmem:[%s258_s2] ss:$0 sm:$0xff] }
   0x5   :  { %v85_v8 = vld [vmem:[%s259_s5] sm:$0xff] }
   0x6   :  { %178 = vmatmul.mubr.msk.bf16.vlgmr.msra.gmra.mxu0 %vm40_vm1, %v24_v2  ;;  %vm86_vm2 = vcmp.lt.u32.totalorder %v85_v8, 3006477107  ;;  %v166_v16 = vld [vmem:[%s260_s4] ss:$0 sm:$0xff] }
   0x7   :  { %184 = vmatpush3.bf16.msra.mxu1 %v193_v4 }
  0xc6   :  { %v78_v6 = vpop.f32.mrf.mxu0 }
  0xc7   :  { %v79_v7 = vadd.f32 %v163_v5, %v78_v6 }
  0xc8   :  { %v179_v9 = vpop.f32.mrf.mxu0 }
  0xc9   :  { %v84_v10 = vmax.f32 %v79_v7, 0.0 }
  0xca   :  { %v81_v11 = vpop.f32.mrf.mxu0 }
  0xcb   :  { %v87_v12 = vmul.f32 1.4285715, %v84_v10 }
  0xcc   :  { %v180_v13 = vpop.f32.mrf.mxu0 }
  0xcd   :  { %v88_v14 = vsel %vm86_vm2, %v87_v12, 0.0 }
  0xce   :  { %v89_v15 = vpack.c.bf16 %v88_v14, %v88_v14 }
  0xd0   :  { %186 = vmatmul.mubr.msk.bf16.vlgmr.msra.gmra.mxu1 %vm113_vm3, %v89_v15 }
 0x190   :  { %v151_v17 = vpop.f32.mrf.mxu1 }
 0x191   :  { %v152_v18 = vadd.f32 %v166_v16, %v151_v17 }
 0x192   :  { %v187_v19 = vpop.f32.mrf.mxu1 }
 0x193   :  { %158 = vst.msk [vmem:[%s261_s6] sm:$0xff] %vm157_vm4, %v152_v18 }
 0x194   :  { %v154_v20 = vpop.f32.mrf.mxu1 }
 0x196   :  { %v188_v21 = vpop.f32.mrf.mxu1 }

</bundles_post_ra>
